<compile_context>
chip_gen: v5e
topology: v5e:2x2
jax: 0.10.0
libtpu: 0.0.40
codegen_flags: <defaults>
</compile_context>

<pallas_src>
import jax
import jax.numpy as jnp
from jax.experimental import pallas as pl
from jax.experimental.pallas import tpu as pltpu


def linear_sigmoid_kernel(b_ref, x_ref, w_ref, o_ref):
    # b_ref: (1,) f32 in SMEM   (collapsed bias)
    # x_ref: (TB, K) in VMEM    (streamed batch tile)
    # w_ref: (1, K) in VMEM     (collapsed weights, resident across the grid)
    # o_ref: (TB, 1) in VMEM
    x = x_ref[...]
    w = w_ref[...]
    # VPU multiply + XLU lane-reduce instead of an MXU matmul (K=32, N=1).
    z = jnp.sum(x * w, axis=-1, keepdims=True) + b_ref[0]
    # sigmoid(z) = 0.5 * (tanh(z/2) + 1): single EUP transcendental, no VPU divide.
    o_ref[...] = (0.5 * (jnp.tanh(0.5 * z) + 1.0)).astype(o_ref.dtype)


def logistic_regression_forward(x, w1, b1, w2, b2, w3, b3, *, block_b=2048):
    B, K = x.shape
    dtype = jnp.float32

    # Collapse the activation-free 3-layer chain into a single affine map
    # (mathematically identical because there is no nonlinearity between layers).
    w_eff = ((w1 @ w2) @ w3).astype(dtype)            # (K, 1)
    b_eff = ((b1 @ w2 + b2) @ w3 + b3).astype(dtype)  # (1, 1)
    w_row = w_eff.reshape(1, K)                       # lane-dense broadcast operand
    b_flat = b_eff.reshape(1)                         # scalar -> SMEM

    tb = min(block_b, B)                              # block_b is a multiple of 8
    grid = (pl.cdiv(B, tb),)

    return pl.pallas_call(
        linear_sigmoid_kernel,
        out_shape=jax.ShapeDtypeStruct((B, 1), dtype),
        grid=grid,
        in_specs=[
            pl.BlockSpec(memory_space=pltpu.MemorySpace.SMEM),  # b_eff scalar
            pl.BlockSpec((tb, K), lambda i: (i, 0)),            # x: streamed tiles
            pl.BlockSpec((1, K), lambda i: (0, 0)),             # w_row: resident
        ],
        out_specs=pl.BlockSpec((tb, 1), lambda i: (i, 0)),
        compiler_params=pltpu.CompilerParams(
            dimension_semantics=("parallel",),                  # v7x: 2 TCs share the batch axis
        ),
    )(b_flat, x, w_row)


def init_params(key, n_input_features):
    # Deterministic init mimicking nn.Linear's uniform(-1/sqrt(fan_in), 1/sqrt(fan_in)).
    dims = [(n_input_features, 16), (16, 8), (8, 1)]
    params = []
    for i, (fan_in, fan_out) in enumerate(dims):
        kw, kb = jax.random.split(jax.random.fold_in(key, i))
        bound = 1.0 / jnp.sqrt(float(fan_in))
        w = jax.random.uniform(kw, (fan_in, fan_out), jnp.float32, -bound, bound)
        b = jax.random.uniform(kb, (1, fan_out), jnp.float32, -bound, bound)
        params += [w, b]
    return params


if __name__ == "__main__":
    key = jax.random.PRNGKey(0)
    n_input_features = 32
    batch = 8

    kx, kp = jax.random.split(key)
    x = jax.random.normal(kx, (batch, n_input_features), jnp.float32)
    w1, b1, w2, b2, w3, b3 = init_params(kp, n_input_features)

    out = logistic_regression_forward(x, w1, b1, w2, b2, w3, b3)
    jax.block_until_ready(out)

    # Reference check in plain JAX (layer-by-layer, matching the PyTorch module).
    ref = jax.nn.sigmoid(((x @ w1 + b1) @ w2 + b2) @ w3 + b3)
    assert out.shape == (batch, 1)
    assert jnp.allclose(out, ref, atol=1e-5, rtol=1e-5)
    print("KERNEL_OK")
</pallas_src>

<mosaic_0001>
module attributes {stable_mosaic.version = 11 : i64} {
  func.func @linear_sigmoid_kernel(%arg0: i32, %arg1: memref<1xf32, #tpu.memory_space<smem>>, %arg2: memref<8x32xf32, #tpu.memory_space<vmem>>, %arg3: memref<1x32xf32, #tpu.memory_space<vmem>>, %arg4: memref<8x1xf32, #tpu.memory_space<vmem>>) attributes {dimension_semantics = [#tpu.dimension_semantics<parallel>], iteration_bounds = array<i64: 1>, scalar_prefetch = 0 : i64, scratch_operands = 0 : i64, tpu.core_type = #tpu.core_type<tc>, window_params = [{transform_indices = @transform_0, window_bounds = array<i64: 1>}, {transform_indices = @transform_1, window_bounds = array<i64: 8, 32>}, {pipeline_mode = #tpu.pipeline_mode<synchronous>, transform_indices = @transform_2, window_bounds = array<i64: 1, 32>}, {transform_indices = @transform_3, window_bounds = array<i64: 8, 1>}]} {
    %c0 = arith.constant 0 : index
    %c0_0 = arith.constant 0 : index
    %0 = vector.load %arg2[%c0, %c0_0] : memref<8x32xf32, #tpu.memory_space<vmem>>, vector<8x32xf32>
    %c0_1 = arith.constant 0 : index
    %c0_2 = arith.constant 0 : index
    %1 = vector.load %arg3[%c0_1, %c0_2] : memref<1x32xf32, #tpu.memory_space<vmem>>, vector<1x32xf32>
    %2 = vector.broadcast %1 : vector<1x32xf32> to vector<8x32xf32>
    %3 = arith.mulf %0, %2 : vector<8x32xf32>
    %cst = arith.constant dense<0.000000e+00> : vector<8xf32>
    %4 = vector.multi_reduction <add>, %3, %cst [1] : vector<8x32xf32> to vector<8xf32>
    %5 = vector.shape_cast %4 : vector<8xf32> to vector<8x1xf32>
    %c0_3 = arith.constant 0 : index
    %6 = memref.load %arg1[%c0_3] : memref<1xf32, #tpu.memory_space<smem>>
    %7 = vector.broadcast %6 : f32 to vector<8x1xf32>
    %8 = arith.addf %5, %7 : vector<8x1xf32>
    %cst_4 = arith.constant 5.000000e-01 : f32
    %9 = vector.broadcast %cst_4 : f32 to vector<8x1xf32>
    %10 = arith.mulf %9, %8 : vector<8x1xf32>
    %11 = math.tanh %10 : vector<8x1xf32>
    %cst_5 = arith.constant 1.000000e+00 : f32
    %12 = vector.broadcast %cst_5 : f32 to vector<8x1xf32>
    %13 = arith.addf %11, %12 : vector<8x1xf32>
    %cst_6 = arith.constant 5.000000e-01 : f32
    %14 = vector.broadcast %cst_6 : f32 to vector<8x1xf32>
    %15 = arith.mulf %14, %13 : vector<8x1xf32>
    %c0_7 = arith.constant 0 : index
    %c0_8 = arith.constant 0 : index
    %16 = vector.load %arg4[%c0_7, %c0_8] : memref<8x1xf32, #tpu.memory_space<vmem>>, vector<8x1xf32>
    tpu.vector_store %arg4[%c0_7, %c0_8], %15 {strides = array<i32>} : memref<8x1xf32, #tpu.memory_space<vmem>>, vector<8x1xf32>,
    return
  }
  func.func @transform_0(%arg0: i32) -> i32 {
    %c0_i32 = arith.constant 0 : i32
    %c0_i32_0 = arith.constant 0 : i32
    return %c0_i32 : i32
  }
  func.func @transform_1(%arg0: i32) -> (i32, i32) {
    %c0_i32 = arith.constant 0 : i32
    %c0_i32_0 = arith.constant 0 : i32
    return %arg0, %c0_i32 : i32, i32
  }
  func.func @transform_2(%arg0: i32) -> (i32, i32) {
    %c0_i32 = arith.constant 0 : i32
    %c0_i32_0 = arith.constant 0 : i32
    %c0_i32_1 = arith.constant 0 : i32
    return %c0_i32, %c0_i32_0 : i32, i32
  }
  func.func @transform_3(%arg0: i32) -> (i32, i32) {
    %c0_i32 = arith.constant 0 : i32
    %c0_i32_0 = arith.constant 0 : i32
    return %arg0, %c0_i32 : i32, i32
  }
}

</mosaic_0001>

<bundles_post_ra>
// kernel: tpu_custom_call.1
= control target key start
LH: loop header
LB: loop body
LE: loop exit
PB: predicated region body
PF: predicated region fallthrough
CT: control target
= control target key end

     0   :  { %9 = vsyncpa [#allocation4], 0  ;;  %s83_s15 = smov [#allocation3]   ;;  %s116_s0 = inlined_call_operand.<no memory space> [shape: f32[1], index: 0, kind: input, shape index: {}]   ;;  %s117_s1 = inlined_call_operand.hbm [shape: f32[8,32], index: 1, kind: input, shape index: {}]   ;;  %s118_s2 = inlined_call_operand.vmem [shape: f32[1,32], index: 2, kind: input, shape index: {}]   ;;  %s119_s3 = inlined_call_operand.vmem [shape: f32[8,1], index: 3, kind: output, shape index: {}]  }
   0x1   :  { %s17_s14 = sshll.u32 %s117_s1, 4  ;;  %s19_s16 = sshll.u32 %s83_s15, 4  ;;  %s18_s14 = int_to_ptr.hbm [resolvable:$true] %s17_s14  ;;  %s20_s16 = int_to_ptr.vmem [resolvable:$true] %s19_s16 }
   0x2   :  { %22 = dma.hbm_to_vmem [thread:$0]  %s18_s14, 128, %s20_s16, [#allocation4]  }
   0x3   :  { %81 = dma.done.wait [#allocation4], 128  }
   0x4   :  { %82 = vsyncadd [#allocation4], 4294967168  ;;  %v29_v0 = vld [vmem:[#allocation3] sm:$0xff]  ;;  %vm35_vm0 = vcmask 261120   ;;  %v40_v4 = vstv %s116_s0  ;;  %vm46_vm1 = vcmask 7168  }
   0x5   :  { %v54_v1 = vld [vmem:[%s118_s2] ss:$0 sm:$0xff] }
   0x6   :  { %v34_v2 = vmul.f32 %v54_v1, %v29_v0 }
   0x8   :  { %v36_v3 = vsel %vm35_vm0, %v34_v2, 0.0 }
   0x9   :  { %37 = vadd.xlane.f32.xlu0 %v36_v3 }
  0x7c   :  { %v38_v5 = vpop.xlane.xlu0 %37 }
  0x7d   :  { %v41_v6 = vadd.f32 %v40_v4, %v38_v5 }
  0x7f   :  { %v42_v7 = vmul.f32 0.5, %v41_v6 }
  0x81   :  { %55 = vtanh.f32 %v42_v7 }
  0x87   :  { %v56_v8 = vpop.eup %55 }
  0x88   :  { %v44_v9 = vadd.f32 1.0, %v56_v8 }
  0x8a   :  { %v45_v10 = vmul.f32 0.5, %v44_v9 }
  0x8c   :  { %47 = vst.msk [vmem:[%s119_s3] sm:$0xff] %vm46_vm1, %v45_v10 }
  0x8d   :  { %52 = vsyncpa [#allocation4], 1 }

</bundles_post_ra>
